<compile_context>
chip_gen: v5e
topology: v5e:2x2
jax: 0.10.0
libtpu: 0.0.40
codegen_flags: <defaults>
</compile_context>

<pallas_src>
import jax
import jax.numpy as jnp
from jax.experimental import pallas as pl
from jax.experimental.pallas import tpu as pltpu

_LANE = 128          # lane width: last-dim padding multiple
_SUBLANE_BF16 = 16   # bf16 sublane packing: batch-tile multiple (also fine for f32)


def _round_up(x, m):
    return (x + m - 1) // m * m


def _tpu_vmem_capacity_bytes(default=64 * 1024 * 1024):
    """Per-core VMEM capacity; conservative 64 MiB (v7x) fallback."""
    try:
        info = pltpu.get_tpu_info()
        v = getattr(info, "vmem_capacity_bytes", None)
        if v:
            return int(v)
    except Exception:
        pass
    return default


def _tpu_num_cores(default=1):
    """Number of TensorCores per chip (2 on v7x); 1 if unknown."""
    try:
        info = pltpu.get_tpu_info()
        for attr in ("num_cores", "num_tensorcores", "core_count"):
            v = getattr(info, attr, None)
            if v:
                return int(v)
    except Exception:
        pass
    return default


def mlp_kernel(x_ref, w1_ref, b1_ref, w2_ref, b2_ref, w3_ref, b3_ref, o_ref):
    # x / weights are already bf16 (cast once in the wrapper / prepare_params).
    # All three matmuls run on the MXU with f32 accumulation; bias-add + ReLU
    # stay in f32 on the VPU.  All lane dims except the true n_out are padded
    # to 128, so intermediates are lane-dense.
    x = x_ref[...]
    h1 = jnp.dot(x, w1_ref[...], preferred_element_type=jnp.float32) + b1_ref[...]
    h1 = jnp.maximum(h1, 0.0).astype(jnp.bfloat16)
    h2 = jnp.dot(h1, w2_ref[...], preferred_element_type=jnp.float32) + b2_ref[...]
    h2 = jnp.maximum(h2, 0.0).astype(jnp.bfloat16)
    y = jnp.dot(h2, w3_ref[...], preferred_element_type=jnp.float32) + b3_ref[...]
    o_ref[...] = y.astype(o_ref.dtype)


def _const_spec(shape):
    """BlockSpec for a grid-invariant operand; single-buffered when supported."""
    index_map = lambda i: (0, 0)
    try:
        # Grid-invariant -> no need to double-buffer (saves resident VMEM).
        return pl.BlockSpec(shape, index_map, pipeline_mode=pl.Buffered(1))
    except Exception:  # older jax without pipeline_mode / pl.Buffered
        return pl.BlockSpec(shape, index_map)


def prepare_params(params, *, lane_multiple=_LANE):
    """One-time conversion of torch-layout params to kernel-ready layout.

    nn.Linear stores weight as (out, in); the kernel wants (in, out).  Input
    and hidden feature dims are zero-padded to a multiple of `lane_multiple`
    (exact: padded hidden units have zero weights and zero bias, so they stay
    0 through ReLU and contribute nothing downstream).  Weights are cast to
    bf16 once (f32 accumulation in-kernel); biases stay f32.  The true output
    width is kept unpadded to avoid inflating HBM writeback bytes.
    """
    n_in = params["w1"].shape[1]
    n_hidden = params["w1"].shape[0]
    n_out = params["w3"].shape[0]
    n_in_pad = _round_up(n_in, lane_multiple)
    n_hid_pad = _round_up(n_hidden, lane_multiple)
    pi = n_in_pad - n_in
    ph = n_hid_pad - n_hidden

    return {
        "w1": jnp.pad(params["w1"].T, ((0, pi), (0, ph))).astype(jnp.bfloat16),
        "b1": jnp.pad(params["b1"], ((0, ph),)).reshape(1, -1).astype(jnp.float32),
        "w2": jnp.pad(params["w2"].T, ((0, ph), (0, ph))).astype(jnp.bfloat16),
        "b2": jnp.pad(params["b2"], ((0, ph),)).reshape(1, -1).astype(jnp.float32),
        "w3": jnp.pad(params["w3"].T, ((0, ph), (0, 0))).astype(jnp.bfloat16),
        "b3": params["b3"].reshape(1, -1).astype(jnp.float32),
        "n_in": int(n_in),
        "n_in_pad": int(n_in_pad),
        "n_hid_pad": int(n_hid_pad),
        "n_out": int(n_out),
    }


def mlp_forward(x, prepared, *, tile_b=None):
    """x: (B, n_inputs) float32.  prepared: output of prepare_params()."""
    B, n_in = x.shape
    assert n_in == prepared["n_in"], "input feature width mismatch"
    n_in_pad = prepared["n_in_pad"]
    n_hid_pad = prepared["n_hid_pad"]
    n_out = prepared["n_out"]

    if tile_b is None:
        n_cores = _tpu_num_cores()
        if B >= 1024:
            tile_b = 512                                    # ~85% HBM roofline territory
        elif B >= 256:
            tile_b = 256
        elif n_cores > 1 and B >= 2 * _SUBLANE_BF16:
            # Give each TensorCore at least one tile on multi-TC chips (v7x).
            tile_b = _round_up(pl.cdiv(B, n_cores), _SUBLANE_BF16)
        else:
            # 1-TC chips (v5e/v6e): a single grid step avoids per-step overhead.
            tile_b = _round_up(B, _SUBLANE_BF16)
    # Bound the (tile_b, n_hid_pad) f32 intermediates to ~2 MiB each so larger
    # tiles / padded widths do not flip the kernel into spill-bound.
    cap = max(_SUBLANE_BF16,
              ((2 << 20) // (4 * n_hid_pad)) // _SUBLANE_BF16 * _SUBLANE_BF16)
    tile_b = max(_SUBLANE_BF16, _round_up(min(int(tile_b), cap), _SUBLANE_BF16))

    grid_b = pl.cdiv(B, tile_b)
    b_pad = grid_b * tile_b

    # Pad batch + input features and cast to bf16 once in the wrapper: x is the
    # only per-grid-step streamed operand, so bf16 halves its HBM->VMEM bytes.
    x = jnp.pad(x, ((0, b_pad - B), (0, n_in_pad - n_in))).astype(jnp.bfloat16)

    weight_bytes = sum(int(prepared[k].size) * prepared[k].dtype.itemsize
                       for k in ("w1", "b1", "w2", "b2", "w3", "b3"))
    x_tile_bytes = tile_b * n_in_pad * 2
    out_tile_bytes = tile_b * n_out * 4
    interm_bytes = 4 * tile_b * n_hid_pad * 4        # h1/h2 (f32 + bf16 copies), generous
    needed = 2 * weight_bytes + 2 * x_tile_bytes + 2 * out_tile_bytes + interm_bytes
    vmem_cap = int(0.75 * _tpu_vmem_capacity_bytes())
    vmem_limit = int(min(vmem_cap, max(16 << 20, 2 * needed)))

    flops = 2 * b_pad * (n_in_pad * n_hid_pad + n_hid_pad * n_hid_pad + n_hid_pad * n_out)
    bytes_accessed = int(x.size) * 2 + weight_bytes + b_pad * n_out * 4

    out = pl.pallas_call(
        mlp_kernel,
        out_shape=jax.ShapeDtypeStruct((b_pad, n_out), jnp.float32),
        grid_spec=pltpu.PrefetchScalarGridSpec(
            num_scalar_prefetch=0,
            grid=(grid_b,),
            in_specs=[
                pl.BlockSpec((tile_b, n_in_pad), lambda i: (i, 0)),  # x tile (bf16, streamed)
                _const_spec((n_in_pad, n_hid_pad)),                  # W1^T (bf16, padded)
                _const_spec((1, n_hid_pad)),                         # b1   (f32, padded)
                _const_spec((n_hid_pad, n_hid_pad)),                 # W2^T (bf16, padded)
                _const_spec((1, n_hid_pad)),                         # b2   (f32, padded)
                _const_spec((n_hid_pad, n_out)),                     # W3^T (bf16, true n_out)
                _const_spec((1, n_out)),                             # b3   (f32, true n_out)
            ],
            # True-width output block (= full array dim on the lane axis):
            # avoids 8x f32 writeback inflation from lane-padding a tiny n_out.
            out_specs=pl.BlockSpec((tile_b, n_out), lambda i: (i, 0)),
        ),
        compiler_params=pltpu.CompilerParams(
            dimension_semantics=("parallel",),   # batch axis
            vmem_limit_bytes=vmem_limit,
        ),
        cost_estimate=pl.CostEstimate(
            flops=flops, transcendentals=0, bytes_accessed=bytes_accessed),
    )(x, prepared["w1"], prepared["b1"], prepared["w2"], prepared["b2"],
      prepared["w3"], prepared["b3"])

    return out[:B]


def init_params(key, n_inputs, n_hidden, n_output):
    """Deterministic init mirroring nn.Linear shapes: weight (out, in), bias (out,)."""
    ks = jax.random.split(key, 6)

    def linear(kw, kb, fan_in, fan_out):
        bound = 1.0 / jnp.sqrt(fan_in)
        w = jax.random.uniform(kw, (fan_out, fan_in), jnp.float32, -bound, bound)
        b = jax.random.uniform(kb, (fan_out,), jnp.float32, -bound, bound)
        return w, b

    w1, b1 = linear(ks[0], ks[1], n_inputs, n_hidden)
    w2, b2 = linear(ks[2], ks[3], n_hidden, n_hidden)
    w3, b3 = linear(ks[4], ks[5], n_hidden, n_output)
    return {"w1": w1, "b1": b1, "w2": w2, "b2": b2, "w3": w3, "b3": b3}


if __name__ == "__main__":
    n_inputs, n_hidden, n_output = 32, 32, 16
    batch = 8

    key = jax.random.PRNGKey(0)
    k_params, k_x, k_x2 = jax.random.split(key, 3)
    params = init_params(k_params, n_inputs, n_hidden, n_output)
    prepared = prepare_params(params)  # one-time: transpose / bf16-cast / lane-pad

    def ref(x, p):  # pure-JAX fp32 reference of the same forward pass
        h = jnp.maximum(x @ p["w1"].T + p["b1"], 0.0)
        h = jnp.maximum(h @ p["w2"].T + p["b2"], 0.0)
        return h @ p["w3"].T + p["b3"]

    # Case 1: small batch, single grid step.
    x = jax.random.normal(k_x, (batch, n_inputs), jnp.float32)
    out = jax.block_until_ready(mlp_forward(x, prepared))
    assert out.shape == (batch, n_output)
    # bf16 MXU operands with f32 accumulation -> looser tolerance vs fp32 ref.
    assert jnp.allclose(out, ref(x, params), atol=2e-2, rtol=2e-2)

    # Case 2: ragged batch (not a multiple of tile_b) -> cdiv grid + row padding.
    x2 = jax.random.normal(k_x2, (20, n_inputs), jnp.float32)
    out2 = jax.block_until_ready(mlp_forward(x2, prepared, tile_b=16))
    assert out2.shape == (20, n_output)
    assert jnp.allclose(out2, ref(x2, params), atol=2e-2, rtol=2e-2)

    print("KERNEL_OK")
</pallas_src>

<mosaic_0001>
module attributes {stable_mosaic.version = 11 : i64} {
  func.func @mlp_kernel(%arg0: i32, %arg1: memref<16x128xbf16, #tpu.memory_space<vmem>>, %arg2: memref<128x128xbf16, #tpu.memory_space<vmem>>, %arg3: memref<1x128xf32, #tpu.memory_space<vmem>>, %arg4: memref<128x128xbf16, #tpu.memory_space<vmem>>, %arg5: memref<1x128xf32, #tpu.memory_space<vmem>>, %arg6: memref<128x16xbf16, #tpu.memory_space<vmem>>, %arg7: memref<1x16xf32, #tpu.memory_space<vmem>>, %arg8: memref<16x16xf32, #tpu.memory_space<vmem>>) attributes {dimension_semantics = [#tpu.dimension_semantics<parallel>], iteration_bounds = array<i64: 1>, scalar_prefetch = 0 : i64, scratch_operands = 0 : i64, tpu.core_type = #tpu.core_type<tc>, window_params = [{transform_indices = @transform_0, window_bounds = array<i64: 16, 128>}, {pipeline_mode = #tpu.pipeline_mode<synchronous>, transform_indices = @transform_1, window_bounds = array<i64: 128, 128>}, {pipeline_mode = #tpu.pipeline_mode<synchronous>, transform_indices = @transform_2, window_bounds = array<i64: 1, 128>}, {pipeline_mode = #tpu.pipeline_mode<synchronous>, transform_indices = @transform_3, window_bounds = array<i64: 128, 128>}, {pipeline_mode = #tpu.pipeline_mode<synchronous>, transform_indices = @transform_4, window_bounds = array<i64: 1, 128>}, {pipeline_mode = #tpu.pipeline_mode<synchronous>, transform_indices = @transform_5, window_bounds = array<i64: 128, 16>}, {pipeline_mode = #tpu.pipeline_mode<synchronous>, transform_indices = @transform_6, window_bounds = array<i64: 1, 16>}, {transform_indices = @transform_7, window_bounds = array<i64: 16, 16>}]} {
    %c0 = arith.constant 0 : index
    %c0_0 = arith.constant 0 : index
    %0 = vector.load %arg1[%c0, %c0_0] : memref<16x128xbf16, #tpu.memory_space<vmem>>, vector<16x128xbf16>
    %c0_1 = arith.constant 0 : index
    %c0_2 = arith.constant 0 : index
    %1 = vector.load %arg2[%c0_1, %c0_2] : memref<128x128xbf16, #tpu.memory_space<vmem>>, vector<128x128xbf16>
    %cst = arith.constant dense<0.000000e+00> : vector<16x128xf32>
    %2 = tpu.matmul %0, %1, %cst {dimension_numbers = #tpu.dot_dimension_numbers<[1], [0], [0], [1], [0, 0, 1, 1], [], []>} : vector<16x128xbf16>, vector<128x128xbf16>, vector<16x128xf32> -> vector<16x128xf32>
    %c0_3 = arith.constant 0 : index
    %c0_4 = arith.constant 0 : index
    %3 = vector.load %arg3[%c0_3, %c0_4] : memref<1x128xf32, #tpu.memory_space<vmem>>, vector<1x128xf32>
    %4 = vector.broadcast %3 : vector<1x128xf32> to vector<16x128xf32>
    %5 = arith.addf %2, %4 : vector<16x128xf32>
    %cst_5 = arith.constant 0.000000e+00 : f32
    %6 = vector.broadcast %cst_5 : f32 to vector<16x128xf32>
    %7 = arith.maximumf %5, %6 : vector<16x128xf32>
    %8 = arith.truncf %7 : vector<16x128xf32> to vector<16x128xbf16>
    %c0_6 = arith.constant 0 : index
    %c0_7 = arith.constant 0 : index
    %9 = vector.load %arg4[%c0_6, %c0_7] : memref<128x128xbf16, #tpu.memory_space<vmem>>, vector<128x128xbf16>
    %cst_8 = arith.constant dense<0.000000e+00> : vector<16x128xf32>
    %10 = tpu.matmul %8, %9, %cst_8 {dimension_numbers = #tpu.dot_dimension_numbers<[1], [0], [0], [1], [0, 0, 1, 1], [], []>} : vector<16x128xbf16>, vector<128x128xbf16>, vector<16x128xf32> -> vector<16x128xf32>
    %c0_9 = arith.constant 0 : index
    %c0_10 = arith.constant 0 : index
    %11 = vector.load %arg5[%c0_9, %c0_10] : memref<1x128xf32, #tpu.memory_space<vmem>>, vector<1x128xf32>
    %12 = vector.broadcast %11 : vector<1x128xf32> to vector<16x128xf32>
    %13 = arith.addf %10, %12 : vector<16x128xf32>
    %cst_11 = arith.constant 0.000000e+00 : f32
    %14 = vector.broadcast %cst_11 : f32 to vector<16x128xf32>
    %15 = arith.maximumf %13, %14 : vector<16x128xf32>
    %16 = arith.truncf %15 : vector<16x128xf32> to vector<16x128xbf16>
    %c0_12 = arith.constant 0 : index
    %c0_13 = arith.constant 0 : index
    %17 = vector.load %arg6[%c0_12, %c0_13] : memref<128x16xbf16, #tpu.memory_space<vmem>>, vector<128x16xbf16>
    %cst_14 = arith.constant dense<0.000000e+00> : vector<16x16xf32>
    %18 = tpu.matmul %16, %17, %cst_14 {dimension_numbers = #tpu.dot_dimension_numbers<[1], [0], [0], [1], [0, 0, 1, 1], [], []>} : vector<16x128xbf16>, vector<128x16xbf16>, vector<16x16xf32> -> vector<16x16xf32>
    %c0_15 = arith.constant 0 : index
    %c0_16 = arith.constant 0 : index
    %19 = vector.load %arg7[%c0_15, %c0_16] : memref<1x16xf32, #tpu.memory_space<vmem>>, vector<1x16xf32>
    %20 = vector.broadcast %19 : vector<1x16xf32> to vector<16x16xf32>
    %21 = arith.addf %18, %20 : vector<16x16xf32>
    %c0_17 = arith.constant 0 : index
    %c0_18 = arith.constant 0 : index
    %22 = vector.load %arg8[%c0_17, %c0_18] : memref<16x16xf32, #tpu.memory_space<vmem>>, vector<16x16xf32>
    tpu.vector_store %arg8[%c0_17, %c0_18], %21 {strides = array<i32>} : memref<16x16xf32, #tpu.memory_space<vmem>>, vector<16x16xf32>,
    return
  }
  func.func @transform_0(%arg0: i32) -> (i32, i32) {
    %c0_i32 = arith.constant 0 : i32
    %c0_i32_0 = arith.constant 0 : i32
    return %arg0, %c0_i32 : i32, i32
  }
  func.func @transform_1(%arg0: i32) -> (i32, i32) {
    %c0_i32 = arith.constant 0 : i32
    %c0_i32_0 = arith.constant 0 : i32
    %c0_i32_1 = arith.constant 0 : i32
    return %c0_i32, %c0_i32_0 : i32, i32
  }
  func.func @transform_2(%arg0: i32) -> (i32, i32) {
    %c0_i32 = arith.constant 0 : i32
    %c0_i32_0 = arith.constant 0 : i32
    %c0_i32_1 = arith.constant 0 : i32
    return %c0_i32, %c0_i32_0 : i32, i32
  }
  func.func @transform_3(%arg0: i32) -> (i32, i32) {
    %c0_i32 = arith.constant 0 : i32
    %c0_i32_0 = arith.constant 0 : i32
    %c0_i32_1 = arith.constant 0 : i32
    return %c0_i32, %c0_i32_0 : i32, i32
  }
  func.func @transform_4(%arg0: i32) -> (i32, i32) {
    %c0_i32 = arith.constant 0 : i32
    %c0_i32_0 = arith.constant 0 : i32
    %c0_i32_1 = arith.constant 0 : i32
    return %c0_i32, %c0_i32_0 : i32, i32
  }
  func.func @transform_5(%arg0: i32) -> (i32, i32) {
    %c0_i32 = arith.constant 0 : i32
    %c0_i32_0 = arith.constant 0 : i32
    %c0_i32_1 = arith.constant 0 : i32
    return %c0_i32, %c0_i32_0 : i32, i32
  }
  func.func @transform_6(%arg0: i32) -> (i32, i32) {
    %c0_i32 = arith.constant 0 : i32
    %c0_i32_0 = arith.constant 0 : i32
    %c0_i32_1 = arith.constant 0 : i32
    return %c0_i32, %c0_i32_0 : i32, i32
  }
  func.func @transform_7(%arg0: i32) -> (i32, i32) {
    %c0_i32 = arith.constant 0 : i32
    %c0_i32_0 = arith.constant 0 : i32
    return %arg0, %c0_i32 : i32, i32
  }
}

</mosaic_0001>

<bundles_post_ra>
// kernel: tpu_custom_call.1
= control target key start
LH: loop header
LB: loop body
LE: loop exit
PB: predicated region body
PF: predicated region fallthrough
CT: control target
= control target key end

     0   :  { %12 = vsyncpa [#allocation3], 0  ;;  %s623_s0 = inlined_call_operand.vmem [shape: bf16[16,128], index: 0, kind: input, shape index: {}]   ;;  %s624_s1 = inlined_call_operand.vmem [shape: bf16[128,128], index: 1, kind: input, shape index: {}]   ;;  %s625_s2 = inlined_call_operand.vmem [shape: f32[1,128], index: 2, kind: input, shape index: {}]   ;;  %s626_s3 = inlined_call_operand.hbm [shape: bf16[128,128], index: 3, kind: input, shape index: {}]   ;;  %s627_s4 = inlined_call_operand.vmem [shape: f32[1,128], index: 4, kind: input, shape index: {}]   ;;  %s628_s5 = inlined_call_operand.vmem [shape: bf16[128,16], index: 5, kind: input, shape index: {}]   ;;  %s629_s6 = inlined_call_operand.vmem [shape: f32[1,16], index: 6, kind: input, shape index: {}]   ;;  %s630_s7 = inlined_call_operand.hbm [shape: f32[16,16], index: 7, kind: output, shape index: {}]  }
   0x1   :  { %13 = vsyncpa [#allocation4], 0  ;;  %s24_s26 = sshll.u32 %s626_s3, 4  ;;  %s511_s27 = smov [#allocation2]   ;;  %s25_s26 = int_to_ptr.hbm [resolvable:$true] %s24_s26 }
   0x2   :  { %s26_s28 = sshll.u32 %s511_s27, 4  ;;  %s512_s29 = smov 64   ;;  %s27_s28 = int_to_ptr.vmem [resolvable:$true] %s26_s28 }
   0x3   :  { %s513_s30 = smov 4  }
   0x4   :  { %32 = dma.hbm_to_vmem [thread:$0]  %s25_s26, 1024, %s27_s28, [#allocation3], %s512_s29, %s512_s29, %s513_s30  }
   0x5   :  { %507 = dma.done.wait [#allocation3], 1024  }
   0x6   :  { %508 = vsyncadd [#allocation3], 4294966272  ;;  %v433_v0 = vld [vmem:[%s624_s1 + $0x38] sm:$0xff]  ;;  %v432_v1 = vld [vmem:[%s624_s1 + $0x30] sm:$0xff]  ;;  %vm303_vm0 = vcmask 130048   ;;  %s515_s23 = smov 128  }
   0x7   :  { %119 = vmatpush.bf16.msra.mxu0 %v433_v0  ;;  %v441_v2 = vld [vmem:[#allocation2 + $0x38] sm:$0xff]  ;;  %v440_v3 = vld [vmem:[#allocation2 + $0x30] sm:$0xff]  ;;  %v431_v4 = vld [vmem:[%s624_s1 + $0x28] sm:$0xff]  ;;  %s516_s24 = smov 8  }
   0x8   :  { %204 = vmatpush.bf16.msra.mxu1 %v441_v2  ;;  %v439_v5 = vld [vmem:[#allocation2 + $0x28] sm:$0xff]  ;;  %v430_v6 = vld [vmem:[%s624_s1 + $0x20] sm:$0xff]  ;;  %v429_v8 = vld [vmem:[%s624_s1 + $0x18] sm:$0xff] }
   0x9   :  { %v438_v7 = vld [vmem:[#allocation2 + $0x20] sm:$0xff]  ;;  %v428_v9 = vld [vmem:[%s624_s1 + $0x10] sm:$0xff]  ;;  %v427_v10 = vld [vmem:[%s624_s1 + $0x8] sm:$0xff] }
   0xa   :  { %v426_v11 = vld [vmem:[%s624_s1] sm:$0xff]  ;;  %v437_v13 = vld [vmem:[#allocation2 + $0x18] sm:$0xff]  ;;  %v436_v14 = vld [vmem:[#allocation2 + $0x10] sm:$0xff] }
   0xb   :  { %120 = vmatpush.bf16.msra.mxu0 %v432_v1  ;;  %v425_v12 = vld [vmem:[%s623_s0] sm:$0xff]  ;;  %v435_v15 = vld [vmem:[#allocation2 + $0x8] sm:$0xff]  ;;  %v449_v17 = vld [vmem:[%s628_s5 + $0x38] sm:$0xff] }
   0xc   :  { %205 = vmatpush.bf16.msra.mxu1 %v440_v3  ;;  %v434_v16 = vld [vmem:[#allocation2] sm:$0xff]  ;;  %289 = vmatpush.bf16.msra.mxu2 %v449_v17  ;;  %v448_v18 = vld [vmem:[%s628_s5 + $0x30] sm:$0xff]  ;;  %v447_v19 = vld [vmem:[%s628_s5 + $0x28] sm:$0xff] }
   0xd   :  { %v446_v20 = vld [vmem:[%s628_s5 + $0x20] sm:$0xff]  ;;  %v445_v29 = vld [vmem:[%s628_s5 + $0x18] sm:$0xff]  ;;  %v444_v30 = vld [vmem:[%s628_s5 + $0x10] sm:$0xff] }
   0xe   :  { %v456_v22 = vld [vmem:[%s625_s2] ss:$0 sm:$0xff]  ;;  %v443_v31 = vld [vmem:[%s628_s5 + $0x8] sm:$0xff] }
   0xf   :  { %121 = vmatpush.bf16.msra.mxu0 %v431_v4  ;;  %v442_v32 = vld [vmem:[%s628_s5] sm:$0xff]  ;;  %s514_s5 = smov [#allocation5]  }
  0x10   :  { %206 = vmatpush.bf16.msra.mxu1 %v439_v5  ;;  %290 = vmatpush.bf16.msra.mxu2 %v448_v18  ;;  %v457_v34 = vld [vmem:[%s627_s4] ss:$0 sm:$0xff]  ;;  %s310_s20 = sshll.u32 %s514_s5, 4  ;;  %s312_s4 = sshll.u32 %s630_s7, 4  ;;  %s311_s20 = int_to_ptr.vmem [resolvable:$true] %s310_s20  ;;  %s313_s4 = int_to_ptr.hbm [resolvable:$true] %s312_s4 }
  0x11   :  { %v458_v41 = vld [vmem:[%s629_s6] ss:$0 sm:$0xff] }
  0x13   :  { %122 = vmatpush.bf16.msra.mxu0 %v430_v6 }
  0x14   :  { %207 = vmatpush.bf16.msra.mxu1 %v438_v7  ;;  %291 = vmatpush.bf16.msra.mxu2 %v447_v19 }
  0x17   :  { %123 = vmatpush.bf16.msra.mxu0 %v429_v8 }
  0x18   :  { %208 = vmatpush.bf16.msra.mxu1 %v437_v13  ;;  %292 = vmatpush.bf16.msra.mxu2 %v446_v20 }
  0x1b   :  { %124 = vmatpush.bf16.msra.mxu0 %v428_v9 }
  0x1c   :  { %209 = vmatpush.bf16.msra.mxu1 %v436_v14  ;;  %293 = vmatpush.bf16.msra.mxu2 %v445_v29 }
  0x1f   :  { %125 = vmatpush.bf16.msra.mxu0 %v427_v10 }
  0x20   :  { %210 = vmatpush.bf16.msra.mxu1 %v435_v15  ;;  %294 = vmatpush.bf16.msra.mxu2 %v444_v30 }
  0x23   :  { %126 = vmatpush.bf16.msra.mxu0 %v426_v11 }
  0x24   :  { %211 = vmatpush.bf16.msra.mxu1 %v434_v16  ;;  %295 = vmatpush.bf16.msra.mxu2 %v443_v31 }
  0x26   :  { %127 = vmatmul.bf16.vlgmr.msra.gmra.mxu0 %v425_v12 }
  0x28   :  { %296 = vmatpush.bf16.msra.mxu2 %v442_v32 }
  0xa3   :  { %v128_v21 = vpop.f32.mrf.mxu0 }
  0xa4   :  { %v129_v23 = vadd.f32 %v456_v22, %v128_v21 }
  0xa6   :  { %v133_v26 = vmax.f32 %v129_v23, 0.0 }
  0xab   :  { %v130_v24 = vpop.f32.mrf.mxu0 }
  0xac   :  { %v131_v25 = vadd.f32 %v456_v22, %v130_v24 }
  0xae   :  { %v134_v27 = vmax.f32 %v131_v25, 0.0 }
  0xb0   :  { %v135_v28 = vpack.c.bf16 %v134_v27, %v133_v26 }
  0xb2   :  { %212 = vmatmul.bf16.vlgmr.msra.gmra.mxu1 %v135_v28 }
 0x12f   :  { %v213_v33 = vpop.f32.mrf.mxu1 }
 0x130   :  { %v214_v35 = vadd.f32 %v457_v34, %v213_v33 }
 0x132   :  { %v218_v38 = vmax.f32 %v214_v35, 0.0 }
 0x137   :  { %v215_v36 = vpop.f32.mrf.mxu1 }
 0x138   :  { %v216_v37 = vadd.f32 %v457_v34, %v215_v36 }
 0x13a   :  { %v219_v39 = vmax.f32 %v216_v37, 0.0 }
 0x13c   :  { %v220_v40 = vpack.c.bf16 %v219_v39, %v218_v38 }
 0x13e   :  { %297 = vmatmul.bf16.vlgmr.msra.gmra.mxu2 %v220_v40 }
 0x1c1   :  { %v298_v42 = vpop.f32.mrf.mxu2 }
 0x1c2   :  { %v299_v43 = vadd.f32 %v458_v41, %v298_v42 }
 0x1c4   :  { %304 = vst.msk [vmem:[#allocation5] sm:$0xff] %vm303_vm0, %v299_v43 }
 0x1c9   :  { %v300_v44 = vpop.f32.mrf.mxu2 }
 0x1ca   :  { %v301_v45 = vadd.f32 %v458_v41, %v300_v44 }
 0x1cc   :  { %305 = vst.msk [vmem:[#allocation5 + $0x8] sm:$0xff] %vm303_vm0, %v301_v45 }
 0x1cd   :  { %318 = dma.vmem_to_hbm [thread:$0]  %s311_s20, 256, %s313_s4, [#allocation4], %s515_s23, %s515_s23, %s516_s24  }
 0x1ce   :  { %509 = dma.done.wait [#allocation4], 256  }
 0x1cf   :  { %510 = vsyncadd [#allocation4], 4294967040 }
 0x1d0   :  { %323 = vsyncpa [#allocation3], 1 }
 0x1d1   :  { %324 = vsyncpa [#allocation4], 1 }

</bundles_post_ra>
